<compile_context>
chip_gen: v5e
topology: v5e:2x2
jax: 0.10.0
libtpu: 0.0.40
codegen_flags: <defaults>
</compile_context>

<pallas_src>
import jax
import jax.numpy as jnp
import numpy as np
from jax import lax
from jax.experimental import pallas as pl
from jax.experimental.pallas import tpu as pltpu

BN_EPS = 1e-5


# ----------------------------------------------------------------------------
# Pallas kernel: single step, whole problem resident in VMEM.
#   xcol : (K*K*C, N*HW) bf16   im2col'd activations (contraction on sublanes)
#   xres : (C,     N*HW) f32    residual input
#   wfold: (C,   K*K*C)  bf16   conv weights with BN scale folded in
#   bias : (C, 1)        f32    folded BN bias
#   out  : (C,     N*HW) f32
# ----------------------------------------------------------------------------
def _conv_shortcut_kernel(xcol_ref, xres_ref, wfold_ref, bias_ref, out_ref):
    # One fused MXU matmul: (C, K*K*C) @ (K*K*C, N*HW) -> f32 accumulation.
    y = jnp.dot(wfold_ref[...], xcol_ref[...],
                preferred_element_type=jnp.float32)
    # Folded eval-mode BatchNorm bias (scale already folded into the weights).
    y = y + bias_ref[...]
    # SiLU: y * sigmoid(y); sigmoid(y) == 0.5*tanh(0.5*y) + 0.5 (single EUP op).
    y = y * (0.5 * jnp.tanh(0.5 * y) + 0.5)
    # Residual add; lane-dense (multiple-of-128) unmasked store.
    out_ref[...] = (xres_ref[...] + y).astype(out_ref.dtype)


# ----------------------------------------------------------------------------
# Wrapper: layout plumbing (plain JAX) + pallas_call.
# ----------------------------------------------------------------------------
def conv_shortcut_pallas(x_nchw, wfold_bf16, bias, *, K):
    N, C, H, W = x_nchw.shape
    p = K // 2
    HW = H * W
    NHW = N * HW

    x_f32 = x_nchw.astype(jnp.float32)

    # Full K*K im2col in bf16: pad, take all K*K spatial shifts, order rows as
    # (ky, kx, cin) and columns as (n, h, w).
    xpad = jnp.pad(x_f32, ((0, 0), (0, 0), (p, p), (p, p))).astype(jnp.bfloat16)
    shifts = [xpad[:, :, ky:ky + H, kx:kx + W]
              for ky in range(K) for kx in range(K)]            # K*K x (N,C,H,W)
    xcol = jnp.transpose(jnp.stack(shifts, axis=0),
                         (0, 2, 1, 3, 4)).reshape(K * K * C, NHW)

    # Residual in the kernel's (C, N*HW) layout, kept in f32.
    xres = jnp.transpose(x_f32, (1, 0, 2, 3)).reshape(C, NHW)

    out = pl.pallas_call(
        _conv_shortcut_kernel,
        out_shape=jax.ShapeDtypeStruct((C, NHW), jnp.float32),
        grid=(1,),
        in_specs=[
            pl.BlockSpec((K * K * C, NHW), lambda i: (0, 0)),
            pl.BlockSpec((C, NHW), lambda i: (0, 0)),
            pl.BlockSpec((C, K * K * C), lambda i: (0, 0)),
            pl.BlockSpec((C, 1), lambda i: (0, 0)),
        ],
        out_specs=pl.BlockSpec((C, NHW), lambda i: (0, 0)),
        compiler_params=pltpu.CompilerParams(
            dimension_semantics=("arbitrary",)),
    )(xcol, xres, wfold_bf16, bias)

    # (C, N*HW) -> (N, C, H, W); wrapper-side layout plumbing (plain XLA).
    return jnp.transpose(out.reshape(C, N, H, W), (1, 0, 2, 3))


# ----------------------------------------------------------------------------
# Parameter construction (PyTorch-equivalent shapes, deterministic).
# ----------------------------------------------------------------------------
def make_params(key, C, K):
    k1, k2, k3, k4, k5 = jax.random.split(key, 5)
    w = 0.1 * jax.random.normal(k1, (C, C, K, K), jnp.float32)  # OIHW, no bias
    gamma = 1.0 + 0.1 * jax.random.normal(k2, (C,), jnp.float32)
    beta = 0.1 * jax.random.normal(k3, (C,), jnp.float32)
    mean = 0.1 * jax.random.normal(k4, (C,), jnp.float32)
    var = 1.0 + 0.1 * jnp.abs(jax.random.normal(k5, (C,), jnp.float32))
    raw = dict(w=w, gamma=gamma, beta=beta, mean=mean, var=var)

    # Fold eval-mode BatchNorm: scale into the weights (f32, then bf16 cast),
    # bias as a (C, 1) column so it broadcasts over the lane (N*HW) axis.
    scale = gamma / jnp.sqrt(var + BN_EPS)                      # (C,)
    bias = (beta - mean * scale)[:, None]                       # (C, 1) f32

    w_scaled = w * scale[:, None, None, None]                   # f32 fold first
    # wfold[o, (ky*K+kx)*C + i] = scale[o] * w[o, i, ky, kx]
    wfold = jnp.transpose(w_scaled, (0, 2, 3, 1)).reshape(C, K * K * C)

    return raw, wfold.astype(jnp.bfloat16), bias


# ----------------------------------------------------------------------------
# Pure-JAX reference (NCHW, mirrors the PyTorch forward in eval mode).
# ----------------------------------------------------------------------------
def conv_shortcut_ref(x, raw):
    K = raw["w"].shape[2]
    p = K // 2
    y = lax.conv_general_dilated(
        x, raw["w"], window_strides=(1, 1), padding=[(p, p), (p, p)],
        dimension_numbers=("NCHW", "OIHW", "NCHW"))
    scale = raw["gamma"] / jnp.sqrt(raw["var"] + BN_EPS)
    shift = raw["beta"] - raw["mean"] * scale
    y = y * scale[None, :, None, None] + shift[None, :, None, None]
    y = y * jax.nn.sigmoid(y)
    return x + y


if __name__ == "__main__":
    # Conv_shortcut(c1=8, c2=8, k, s=1): residual add requires c1 == c2, s=1.
    N, C, H, W = 2, 8, 16, 16

    key = jax.random.PRNGKey(0)
    kx_key, kp3, kp1 = jax.random.split(key, 3)
    x = jax.random.normal(kx_key, (N, C, H, W), jnp.float32)

    for K, kp in ((3, kp3), (1, kp1)):       # 3x3 (as used in YOLOv5) and k=1
        raw, wfold, bias = make_params(kp, C, K)
        out = jax.block_until_ready(
            conv_shortcut_pallas(x, wfold, bias, K=K))
        assert out.shape == (N, C, H, W), out.shape
        ref = jax.block_until_ready(conv_shortcut_ref(x, raw))
        np.testing.assert_allclose(np.asarray(out), np.asarray(ref),
                                   rtol=2e-2, atol=2e-2)

    print("KERNEL_OK")
</pallas_src>

<mosaic_0001>
module attributes {stable_mosaic.version = 11 : i64} {
  func.func @_conv_shortcut_kernel(%arg0: i32, %arg1: memref<72x512xbf16, #tpu.memory_space<vmem>>, %arg2: memref<8x512xf32, #tpu.memory_space<vmem>>, %arg3: memref<8x72xbf16, #tpu.memory_space<vmem>>, %arg4: memref<8x1xf32, #tpu.memory_space<vmem>>, %arg5: memref<8x512xf32, #tpu.memory_space<vmem>>) attributes {dimension_semantics = [#tpu.dimension_semantics<arbitrary>], iteration_bounds = array<i64: 1>, scalar_prefetch = 0 : i64, scratch_operands = 0 : i64, tpu.core_type = #tpu.core_type<tc>, window_params = [{pipeline_mode = #tpu.pipeline_mode<synchronous>, transform_indices = @transform_0, window_bounds = array<i64: 72, 512>}, {pipeline_mode = #tpu.pipeline_mode<synchronous>, transform_indices = @transform_1, window_bounds = array<i64: 8, 512>}, {pipeline_mode = #tpu.pipeline_mode<synchronous>, transform_indices = @transform_2, window_bounds = array<i64: 8, 72>}, {pipeline_mode = #tpu.pipeline_mode<synchronous>, transform_indices = @transform_3, window_bounds = array<i64: 8, 1>}, {pipeline_mode = #tpu.pipeline_mode<synchronous>, transform_indices = @transform_4, window_bounds = array<i64: 8, 512>}]} {
    %c0 = arith.constant 0 : index
    %c0_0 = arith.constant 0 : index
    %0 = vector.load %arg3[%c0, %c0_0] : memref<8x72xbf16, #tpu.memory_space<vmem>>, vector<8x72xbf16>
    %c0_1 = arith.constant 0 : index
    %c0_2 = arith.constant 0 : index
    %1 = vector.load %arg1[%c0_1, %c0_2] : memref<72x512xbf16, #tpu.memory_space<vmem>>, vector<72x512xbf16>
    %cst = arith.constant dense<0.000000e+00> : vector<8x512xf32>
    %2 = tpu.matmul %0, %1, %cst {dimension_numbers = #tpu.dot_dimension_numbers<[1], [0], [0], [1], [0, 0, 1, 1], [], []>} : vector<8x72xbf16>, vector<72x512xbf16>, vector<8x512xf32> -> vector<8x512xf32>
    %c0_3 = arith.constant 0 : index
    %c0_4 = arith.constant 0 : index
    %3 = vector.load %arg4[%c0_3, %c0_4] : memref<8x1xf32, #tpu.memory_space<vmem>>, vector<8x1xf32>
    %4 = vector.broadcast %3 : vector<8x1xf32> to vector<8x512xf32>
    %5 = arith.addf %2, %4 : vector<8x512xf32>
    %cst_5 = arith.constant 5.000000e-01 : f32
    %6 = vector.broadcast %cst_5 : f32 to vector<8x512xf32>
    %7 = arith.mulf %6, %5 : vector<8x512xf32>
    %8 = math.tanh %7 : vector<8x512xf32>
    %cst_6 = arith.constant 5.000000e-01 : f32
    %9 = vector.broadcast %cst_6 : f32 to vector<8x512xf32>
    %10 = arith.mulf %9, %8 : vector<8x512xf32>
    %cst_7 = arith.constant 5.000000e-01 : f32
    %11 = vector.broadcast %cst_7 : f32 to vector<8x512xf32>
    %12 = arith.addf %10, %11 : vector<8x512xf32>
    %13 = arith.mulf %5, %12 : vector<8x512xf32>
    %c0_8 = arith.constant 0 : index
    %c0_9 = arith.constant 0 : index
    %14 = vector.load %arg2[%c0_8, %c0_9] : memref<8x512xf32, #tpu.memory_space<vmem>>, vector<8x512xf32>
    %15 = arith.addf %14, %13 : vector<8x512xf32>
    %c0_10 = arith.constant 0 : index
    %c0_11 = arith.constant 0 : index
    %16 = vector.load %arg5[%c0_10, %c0_11] : memref<8x512xf32, #tpu.memory_space<vmem>>, vector<8x512xf32>
    tpu.vector_store %arg5[%c0_10, %c0_11], %15 {strides = array<i32>} : memref<8x512xf32, #tpu.memory_space<vmem>>, vector<8x512xf32>,
    return
  }
  func.func @transform_0(%arg0: i32) -> (i32, i32) {
    %c0_i32 = arith.constant 0 : i32
    %c0_i32_0 = arith.constant 0 : i32
    %c0_i32_1 = arith.constant 0 : i32
    return %c0_i32, %c0_i32_0 : i32, i32
  }
  func.func @transform_1(%arg0: i32) -> (i32, i32) {
    %c0_i32 = arith.constant 0 : i32
    %c0_i32_0 = arith.constant 0 : i32
    %c0_i32_1 = arith.constant 0 : i32
    return %c0_i32, %c0_i32_0 : i32, i32
  }
  func.func @transform_2(%arg0: i32) -> (i32, i32) {
    %c0_i32 = arith.constant 0 : i32
    %c0_i32_0 = arith.constant 0 : i32
    %c0_i32_1 = arith.constant 0 : i32
    return %c0_i32, %c0_i32_0 : i32, i32
  }
  func.func @transform_3(%arg0: i32) -> (i32, i32) {
    %c0_i32 = arith.constant 0 : i32
    %c0_i32_0 = arith.constant 0 : i32
    %c0_i32_1 = arith.constant 0 : i32
    return %c0_i32, %c0_i32_0 : i32, i32
  }
  func.func @transform_4(%arg0: i32) -> (i32, i32) {
    %c0_i32 = arith.constant 0 : i32
    %c0_i32_0 = arith.constant 0 : i32
    %c0_i32_1 = arith.constant 0 : i32
    return %c0_i32, %c0_i32_0 : i32, i32
  }
}

</mosaic_0001>

<bundles_post_ra>
// kernel: tpu_custom_call.1
= control target key start
LH: loop header
LB: loop body
LE: loop exit
PB: predicated region body
PF: predicated region fallthrough
CT: control target
= control target key end

     0   :  { %9 = vsyncpa [#allocation3], 0  ;;  %s510_s0 = inlined_call_operand.hbm [shape: bf16[72,512], index: 0, kind: input, shape index: {}]   ;;  %s511_s1 = inlined_call_operand.hbm [shape: f32[8,512], index: 1, kind: input, shape index: {}]   ;;  %s512_s2 = inlined_call_operand.vmem [shape: bf16[8,72], index: 2, kind: input, shape index: {}]   ;;  %s513_s3 = inlined_call_operand.vmem [shape: f32[8,1], index: 3, kind: input, shape index: {}]   ;;  %s514_s4 = inlined_call_operand.hbm [shape: f32[8,512], index: 4, kind: output, shape index: {}]  }
   0x1   :  { %10 = vsyncpa [#allocation6], 0 }
   0x2   :  { %11 = vsyncpa [#allocation4], 0  ;;  %s16_s17 = sshll.u32 %s510_s0, 4  ;;  %s460_s18 = smov [#allocation2]   ;;  %s17_s17 = int_to_ptr.hbm [resolvable:$true] %s16_s17 }
   0x3   :  { %s18_s19 = sshll.u32 %s460_s18, 4  ;;  %s30_s22 = sshll.u32 %s511_s1, 4  ;;  %s19_s19 = int_to_ptr.vmem [resolvable:$true] %s18_s19  ;;  %s31_s22 = int_to_ptr.hbm [resolvable:$true] %s30_s22 }
   0x4   :  { %s461_s23 = smov 256   ;;  %s462_s24 = smov 16  }
   0x5   :  { %24 = dma.hbm_to_vmem [thread:$0]  %s17_s17, 2304, %s19_s19, [#allocation3], %s461_s23, %s461_s23, %s462_s24  }
   0x6   :  { %s463_s25 = smov [#allocation5]  }
   0x7   :  { %s32_s26 = sshll.u32 %s463_s25, 4  ;;  %s33_s26 = int_to_ptr.vmem [resolvable:$true] %s32_s26 }
   0x8   :  { %35 = dma.hbm_to_vmem [thread:$0]  %s31_s22, 512, %s33_s26, [#allocation6]  }
   0x9   :  { %454 = dma.done.wait [#allocation3], 2304  }
   0xa   :  { %455 = vsyncadd [#allocation3], 4294964992 }
   0xb   :  { %456 = dma.done.wait [#allocation6], 512  }
   0xc   :  { %457 = vsyncadd [#allocation6], 4294966784  ;;  %v464_v0 = vmov 0   ;;  %v66_v1 = vld [vmem:[#allocation2 + $0x80] sm:$0xff]  ;;  %v67_v2 = vld [vmem:[#allocation2 + $0x88] sm:$0xff]  ;;  %vm168_vm0 = vcmask 1043456  }
   0xd   :  { %373 = vset.pattern.permute.xlu0 %v464_v0  ;;  %v124_v3 = vunpack.c.l.b16 %v66_v1  ;;  %v125_v4 = vunpack.c.h.b16 %v66_v1  ;;  %v126_v5 = vunpack.c.l.b16 %v67_v2  ;;  %v127_v6 = vunpack.c.h.b16 %v67_v2  ;;  %v333_v7 = vld [vmem:[#allocation2 + $0x60] sm:$0xf]  ;;  %v365_v8 = vld [vmem:[#allocation2 + $0x6c] sm:$0xf0]  ;;  %v363_v13 = vld [vmem:[#allocation2 + $0x64] sm:$0xf] }
   0xe   :  { %v335_v14 = vld [vmem:[#allocation2 + $0x70] sm:$0xf0]  ;;  %v341_v15 = vld [vmem:[#allocation2 + $0x68] sm:$0xf]  ;;  %v366_v16 = vld [vmem:[#allocation2 + $0x74] sm:$0xf0]  ;;  %v334_v23 = vor.u32 %v365_v8, %v333_v7 }
   0xf   :  { %v144_v9 = vpack.c.b16 %v124_v3, %v124_v3  ;;  %v145_v10 = vpack.c.b16 %v125_v4, %v125_v4  ;;  %v146_v11 = vpack.c.b16 %v126_v5, %v126_v5  ;;  %v147_v12 = vpack.c.b16 %v127_v6, %v127_v6  ;;  %v364_v17 = vld [vmem:[#allocation2 + $0x6c] sm:$0xf]  ;;  %v343_v18 = vld [vmem:[#allocation2 + $0x78] sm:$0xf0]  ;;  %v317_v25 = vld [vmem:[#allocation2 + $0x40] sm:$0xf] }
  0x10   :  { %v338_v24 = vor.u32 %v363_v13, %v335_v14  ;;  %v361_v26 = vld [vmem:[#allocation2 + $0x4c] sm:$0xf0]  ;;  %v342_v27 = vor.u32 %v366_v16, %v341_v15  ;;  %v346_v28 = vor.u32 %v364_v17, %v343_v18  ;;  %v359_v29 = vld [vmem:[#allocation2 + $0x44] sm:$0xf]  ;;  %v319_v30 = vld [vmem:[#allocation2 + $0x50] sm:$0xf0] }
  0x11   :  { %v170_v19 = vsel %vm168_vm0, %v144_v9, 0  ;;  %v173_v20 = vsel %vm168_vm0, %v145_v10, 0  ;;  %v176_v21 = vsel %vm168_vm0, %v146_v11, 0  ;;  %v179_v22 = vsel %vm168_vm0, %v147_v12, 0  ;;  %v325_v31 = vld [vmem:[#allocation2 + $0x48] sm:$0xf] }
  0x12   :  { %184 = vmatpush.bf16.msra.mxu0 %v170_v19  ;;  %197 = vmatpush.bf16.msra.mxu1 %v173_v20  ;;  %v362_v32 = vld [vmem:[#allocation2 + $0x54] sm:$0xf0]  ;;  %v360_v33 = vld [vmem:[#allocation2 + $0x4c] sm:$0xf]  ;;  %v327_v34 = vld [vmem:[#allocation2 + $0x58] sm:$0xf0]  ;;  %v318_v35 = vor.u32 %v361_v26, %v317_v25  ;;  %v322_v36 = vor.u32 %v359_v29, %v319_v30 }
  0x13   :  { %210 = vmatpush.bf16.msra.mxu2 %v176_v21  ;;  %223 = vmatpush.bf16.msra.mxu3 %v179_v22  ;;  %v301_v37 = vld [vmem:[#allocation2 + $0x20] sm:$0xf]  ;;  %v357_v38 = vld [vmem:[#allocation2 + $0x2c] sm:$0xf0]  ;;  %v355_v39 = vld [vmem:[#allocation2 + $0x24] sm:$0xf]  ;;  %v326_v40 = vor.u32 %v362_v32, %v325_v31  ;;  %v330_v41 = vor.u32 %v360_v33, %v327_v34 }
  0x14   :  { %v303_v42 = vld [vmem:[#allocation2 + $0x30] sm:$0xf0]  ;;  %v309_v43 = vld [vmem:[#allocation2 + $0x28] sm:$0xf]  ;;  %v358_v44 = vld [vmem:[#allocation2 + $0x34] sm:$0xf0]  ;;  %v302_v48 = vor.u32 %v357_v38, %v301_v37 }
  0x15   :  { %v356_v45 = vld [vmem:[#allocation2 + $0x2c] sm:$0xf]  ;;  %v311_v46 = vld [vmem:[#allocation2 + $0x38] sm:$0xf0]  ;;  %v68_v47 = vld [vmem:[%s513_s3] sm:$0xff]  ;;  %v306_v49 = vor.u32 %v355_v39, %v303_v42  ;;  %v310_v52 = vor.u32 %v358_v44, %v309_v43  ;;  %vm164_vm1 = vcmask 588800  }
  0x16   :  { %185 = vmatpush.bf16.msra.mxu0 %v334_v23  ;;  %198 = vmatpush.bf16.msra.mxu1 %v338_v24  ;;  %v285_v50 = vld [vmem:[#allocation2] sm:$0xf]  ;;  %v353_v51 = vld [vmem:[#allocation2 + $0xc] sm:$0xf0]  ;;  %v314_v53 = vor.u32 %v356_v45, %v311_v46  ;;  %v351_v54 = vld [vmem:[#allocation2 + $0x4] sm:$0xf] }
  0x17   :  { %211 = vmatpush.bf16.msra.mxu2 %v342_v27  ;;  %224 = vmatpush.bf16.msra.mxu3 %v346_v28  ;;  %v287_v55 = vld [vmem:[#allocation2 + $0x10] sm:$0xf0]  ;;  %v293_v56 = vld [vmem:[#allocation2 + $0x8] sm:$0xf]  ;;  %v354_v57 = vld [vmem:[#allocation2 + $0x14] sm:$0xf0]  ;;  %v286_v60 = vor.u32 %v353_v51, %v285_v50 }
  0x18   :  { %71 = vperm.xlu0 %373, %v68_v47   ;;  %v352_v58 = vld [vmem:[#allocation2 + $0xc] sm:$0xf]  ;;  %v295_v59 = vld [vmem:[#allocation2 + $0x18] sm:$0xf0]  ;;  %v290_v61 = vor.u32 %v351_v54, %v287_v55  ;;  %v294_v62 = vor.u32 %v354_v57, %v293_v56  ;;  %v49_v0 = vld [vmem:[%s512_s2] sm:$0xf] }
  0x19   :  { %v298_v63 = vor.u32 %v352_v58, %v295_v59  ;;  %v253_v21 = vld [vmem:[#allocation5] sm:$0xff]  ;;  %v254_v26 = vld [vmem:[#allocation5 + $0x8] sm:$0xff]  ;;  %v256_v38 = vld [vmem:[#allocation5 + $0x18] sm:$0xff]  ;;  %s465_s2 = smov [#allocation7]   ;;  %s272_s5 = sshll.u32 %s514_s4, 4  ;;  %s273_s5 = int_to_ptr.hbm [resolvable:$true] %s272_s5 }
  0x1a   :  { %186 = vmatpush.bf16.msra.mxu0 %v318_v35  ;;  %199 = vmatpush.bf16.msra.mxu1 %v322_v36  ;;  %v255_v35 = vld [vmem:[#allocation5 + $0x10] sm:$0xff]  ;;  %s270_s28 = sshll.u32 %s465_s2, 4  ;;  %s271_s28 = int_to_ptr.vmem [resolvable:$true] %s270_s28 }
  0x1b   :  { %212 = vmatpush.bf16.msra.mxu2 %v326_v40  ;;  %225 = vmatpush.bf16.msra.mxu3 %v330_v41 }
  0x1e   :  { %187 = vmatpush.bf16.msra.mxu0 %v302_v48  ;;  %200 = vmatpush.bf16.msra.mxu1 %v306_v49 }
  0x1f   :  { %213 = vmatpush.bf16.msra.mxu2 %v310_v52  ;;  %226 = vmatpush.bf16.msra.mxu3 %v314_v53 }
  0x22   :  { %188 = vmatpush.bf16.msra.mxu0 %v286_v60  ;;  %201 = vmatpush.bf16.msra.mxu1 %v290_v61 }
  0x23   :  { %214 = vmatpush.bf16.msra.mxu2 %v294_v62  ;;  %227 = vmatpush.bf16.msra.mxu3 %v298_v63 }
  0x25   :  { %347 = vmatmul.msk.bf16.vlgmr.msra.gmra.mxu0 %vm164_vm1, %v49_v0  ;;  %348 = vmatmul.msk.bf16.vlgmr.msra.gmra.mxu1 %vm164_vm1, %v49_v0 }
  0x26   :  { %349 = vmatmul.msk.bf16.vlgmr.msra.gmra.mxu2 %vm164_vm1, %v49_v0  ;;  %350 = vmatmul.msk.bf16.vlgmr.msra.gmra.mxu3 %vm164_vm1, %v49_v0 }
  0x8a   :  { %v72_v1 = vpop.permute.xlu0 %71 }
  0xa2   :  { %v190_v2 = vpop.f32.mrf.mxu0  ;;  %v203_v3 = vpop.f32.mrf.mxu1 }
  0xa3   :  { %v191_v4 = vadd.f32 %v190_v2, %v72_v1  ;;  %v204_v5 = vadd.f32 %v203_v3, %v72_v1 }
  0xa5   :  { %v233_v6 = vmul.f32 0.5, %v191_v4  ;;  %v234_v7 = vmul.f32 0.5, %v204_v5 }
  0xa7   :  { %374 = vtanh.f32 %v233_v6 }
  0xa8   :  { %376 = vtanh.f32 %v234_v7 }
  0xa9   :  { %v216_v8 = vpop.f32.mrf.mxu2  ;;  %v229_v9 = vpop.f32.mrf.mxu3 }
  0xaa   :  { %v217_v10 = vadd.f32 %v216_v8, %v72_v1  ;;  %v230_v11 = vadd.f32 %v229_v9, %v72_v1  ;;  %v192_v12 = vpop.f32.mrf.mxu0  ;;  %v205_v13 = vpop.f32.mrf.mxu1 }
  0xac   :  { %v235_v14 = vmul.f32 0.5, %v217_v10  ;;  %v236_v15 = vmul.f32 0.5, %v230_v11 }
  0xad   :  { %v375_v16 = vpop.eup %374 }
  0xae   :  { %v377_v17 = vpop.eup %376  ;;  %v241_v18 = vmul.f32 0.5, %v375_v16  ;;  %378 = vtanh.f32 %v235_v14 }
  0xaf   :  { %v242_v19 = vmul.f32 0.5, %v377_v17  ;;  %380 = vtanh.f32 %v236_v15 }
  0xb0   :  { %v245_v20 = vadd.f32 0.5, %v241_v18 }
  0xb1   :  { %v246_v22 = vadd.f32 0.5, %v242_v19  ;;  %v218_v23 = vpop.f32.mrf.mxu2  ;;  %v231_v24 = vpop.f32.mrf.mxu3 }
  0xb2   :  { %v249_v25 = vmul.f32 %v245_v20, %v191_v4 }
  0xb3   :  { %v250_v27 = vmul.f32 %v246_v22, %v204_v5 }
  0xb4   :  { %v379_v28 = vpop.eup %378  ;;  %v257_v29 = vadd.f32 %v253_v21, %v249_v25 }
  0xb5   :  { %v381_v30 = vpop.eup %380  ;;  %v258_v31 = vadd.f32 %v254_v26, %v250_v27  ;;  %v243_v32 = vmul.f32 0.5, %v379_v28 }
  0xb6   :  { %261 = vst [vmem:[#allocation7] sm:$0xff] %v257_v29  ;;  %v244_v33 = vmul.f32 0.5, %v381_v30 }
  0xb7   :  { %262 = vst [vmem:[#allocation7 + $0x8] sm:$0xff] %v258_v31  ;;  %v247_v34 = vadd.f32 0.5, %v243_v32 }
  0xb8   :  { %v248_v36 = vadd.f32 0.5, %v244_v33 }
  0xb9   :  { %v251_v37 = vmul.f32 %v247_v34, %v217_v10 }
  0xba   :  { %v252_v39 = vmul.f32 %v248_v36, %v230_v11 }
  0xbb   :  { %v259_v40 = vadd.f32 %v255_v35, %v251_v37 }
  0xbc   :  { %v260_v41 = vadd.f32 %v256_v38, %v252_v39 }
  0xbd   :  { %263 = vst [vmem:[#allocation7 + $0x10] sm:$0xff] %v259_v40 }
  0xbe   :  { %264 = vst [vmem:[#allocation7 + $0x18] sm:$0xff] %v260_v41 }
  0xbf   :  { %275 = dma.vmem_to_hbm [thread:$0]  %s271_s28, 512, %s273_s5, [#allocation4]  }
  0xc0   :  { %458 = dma.done.wait [#allocation4], 512  }
  0xc1   :  { %459 = vsyncadd [#allocation4], 4294966784 }
  0xc2   :  { %280 = vsyncpa [#allocation3], 1 }
  0xc3   :  { %281 = vsyncpa [#allocation6], 1 }
  0xc4   :  { %282 = vsyncpa [#allocation4], 1 }

</bundles_post_ra>
